<compile_context>
chip_gen: v7x
topology: tpu7x:2x2x1
jax: 0.10.0
libtpu: 0.0.40
codegen_flags: <defaults>
</compile_context>

<pallas_src>
import functools

import jax
import jax.numpy as jnp
from jax.experimental import pallas as pl
from jax.experimental.pallas import tpu as pltpu


def _dsconv_kernel(x_ref, wdw_ref, wpw_ref, bpw_ref, mask_ref, o_ref, *, H, W, C, Cout):
    # x_ref:    (1, C, Lext)  flat halo-padded input with a (Wp+1)-wide zero margin on each side
    # wdw_ref:  (C, 9)        depthwise weights, tap index t = kh*3 + kw
    # wpw_ref:  (Cout, C)     pointwise weights (transposed)
    # bpw_ref:  (Cout, 1)     depthwise bias folded through the pointwise weights
    # mask_ref: (1, L)        1.0 on interior output pixels, 0.0 on the 1-pixel border
    # o_ref:    (1, Cout, L)  flat (H+2, W+2) output, lane-dense
    Wp = W + 2
    L = (H + 2) * Wp

    xf = x_ref[0].astype(jnp.float32)        # cast once (not once per tap)
    wdw = wdw_ref[...].astype(jnp.float32)   # (C, 9)

    # Depthwise 3x3: 9 lane-shifted windows of the flat input (XLU lane shifts) times a
    # per-channel weight broadcast, accumulated in f32 on the VPU.  Interior output pixels
    # never read the zero margin; garbage at border pixels is masked off below.
    acc = xf[:, 0:L] * wdw[:, 0:1]
    for kh in range(3):
        for kw in range(3):
            if kh == 0 and kw == 0:
                continue
            t = kh * 3 + kw
            s = kh * Wp + kw                  # == tap offset (kh-1)*Wp + (kw-1) + margin (Wp+1)
            acc = acc + xf[:, s:s + L] * wdw[:, t:t + 1]

    # Pointwise 1x1: C unrolled VPU FMAs into a (Cout, L) accumulator, starting from the
    # folded depthwise bias.  (For C, Cout >= 128 this would become an MXU matmul instead.)
    wpw = wpw_ref[...].astype(jnp.float32)    # (Cout, C)
    out = bpw_ref[...].astype(jnp.float32) + wpw[:, 0:1] * acc[0:1, :]
    for c in range(1, C):
        out = out + wpw[:, c:c + 1] * acc[c:c + 1, :]

    # ReLU, then zero the 1-pixel border created by the pw conv's padding=1 (bias=False).
    out = jnp.maximum(out, 0.0) * mask_ref[...].astype(jnp.float32)
    o_ref[0] = out.astype(o_ref.dtype)


@jax.jit
def depth_sep_conv(x_nchw, wdw, bdw, wpw):
    """x_nchw: (N, C, H, W); wdw: (3, 3, C); bdw: (C,); wpw: (C, Cout).

    Returns (N, Cout, H+2, W+2), matching the PyTorch module (pw conv has padding=1).
    """
    N, C, H, W = x_nchw.shape
    Cout = wpw.shape[1]
    Hp, Wp = H + 2, W + 2
    L = Hp * Wp
    E = Wp + 1                    # shift margin; the kernel assumes exactly Wp + 1
    Lext = L + 2 * E

    # Halo pad for the 3x3 conv, flatten spatial onto the lane axis, then add the flat shift
    # margin.  Stays NCHW -> no transposes; both pads fuse into one pass under jit.
    x_pad = jnp.pad(x_nchw, ((0, 0), (0, 0), (1, 1), (1, 1)))
    x_ext = jnp.pad(x_pad.reshape(N, C, L), ((0, 0), (0, 0), (E, E)))

    wdw9 = jnp.transpose(wdw.reshape(9, C))             # (C, 9): wdw9[c, kh*3 + kw]
    wpw_t = jnp.transpose(wpw)                          # (Cout, C)
    bfold = (bdw @ wpw).reshape(Cout, 1)                # dw bias folded through pw weights

    # Interior mask of the flat (Hp, Wp) output (border is exactly 0: pw bias=False, relu(0)=0).
    r = jnp.arange(Hp)[:, None]
    c = jnp.arange(Wp)[None, :]
    mask = ((r >= 1) & (r <= H) & (c >= 1) & (c <= W)).astype(jnp.float32).reshape(1, L)

    kernel = functools.partial(_dsconv_kernel, H=H, W=W, C=C, Cout=Cout)

    out_flat = pl.pallas_call(
        kernel,
        out_shape=jax.ShapeDtypeStruct((N, Cout, L), x_nchw.dtype),
        grid_spec=pltpu.PrefetchScalarGridSpec(
            num_scalar_prefetch=0,
            grid=(N,),
            in_specs=[
                pl.BlockSpec((1, C, Lext), lambda n: (n, 0, 0)),
                pl.BlockSpec((C, 9), lambda n: (0, 0)),
                pl.BlockSpec((Cout, C), lambda n: (0, 0)),
                pl.BlockSpec((Cout, 1), lambda n: (0, 0)),
                pl.BlockSpec((1, L), lambda n: (0, 0)),
            ],
            out_specs=pl.BlockSpec((1, Cout, L), lambda n: (n, 0, 0)),
        ),
        compiler_params=pltpu.CompilerParams(dimension_semantics=("parallel",)),
    )(x_ext, wdw9, wpw_t, bfold, mask)

    # Trailing-dim split only: same physical layout, no data movement, no transpose.
    return out_flat.reshape(N, Cout, Hp, Wp)


def _reference(x_nchw, wdw, bdw, wpw):
    """Pure-JAX reference using lax.conv_general_dilated (NCHW, like PyTorch)."""
    C = x_nchw.shape[1]
    wdw_oihw = jnp.transpose(wdw, (2, 0, 1))[:, None, :, :]          # (C, 1, 3, 3)
    wpw_oihw = jnp.transpose(wpw, (1, 0))[:, :, None, None]          # (Cout, C, 1, 1)
    dw = jax.lax.conv_general_dilated(
        x_nchw, wdw_oihw, window_strides=(1, 1), padding=((1, 1), (1, 1)),
        feature_group_count=C, dimension_numbers=("NCHW", "OIHW", "NCHW"))
    dw = dw + bdw[None, :, None, None]
    pw = jax.lax.conv_general_dilated(
        dw, wpw_oihw, window_strides=(1, 1), padding=((1, 1), (1, 1)),
        dimension_numbers=("NCHW", "OIHW", "NCHW"))
    return jnp.maximum(pw, 0.0)


if __name__ == "__main__":
    key = jax.random.PRNGKey(0)
    k_x, k_wdw, k_bdw, k_wpw = jax.random.split(key, 4)

    N, C, H, W = 2, 4, 16, 16
    Cout = 8

    x = jax.random.normal(k_x, (N, C, H, W), dtype=jnp.float32)
    wdw = jax.random.normal(k_wdw, (3, 3, C), dtype=jnp.float32) * 0.1   # depthwise weight
    bdw = jax.random.normal(k_bdw, (C,), dtype=jnp.float32) * 0.1        # depthwise bias
    wpw = jax.random.normal(k_wpw, (C, Cout), dtype=jnp.float32) * 0.1   # pointwise weight

    out = depth_sep_conv(x, wdw, bdw, wpw)
    out = jax.block_until_ready(out)

    ref = _reference(x, wdw, bdw, wpw)
    assert out.shape == (N, Cout, H + 2, W + 2), out.shape
    assert jnp.allclose(out, ref, rtol=1e-5, atol=1e-5), "mismatch vs reference"

    print("KERNEL_OK")
</pallas_src>

<mosaic_0001>
module attributes {stable_mosaic.version = 11 : i64} {
  func.func @_dsconv_kernel(%arg0: i32, %arg1: memref<1x4x362xf32, #tpu.memory_space<vmem>>, %arg2: memref<4x9xf32, #tpu.memory_space<vmem>>, %arg3: memref<8x4xf32, #tpu.memory_space<vmem>>, %arg4: memref<8x1xf32, #tpu.memory_space<vmem>>, %arg5: memref<1x324xf32, #tpu.memory_space<vmem>>, %arg6: memref<1x8x324xf32, #tpu.memory_space<vmem>>) attributes {dimension_semantics = [#tpu.dimension_semantics<parallel>], iteration_bounds = array<i64: 2>, scalar_prefetch = 0 : i64, scratch_operands = 0 : i64, tpu.core_type = #tpu.core_type<tc>, window_params = [{transform_indices = @transform_0, window_bounds = array<i64: 1, 4, 362>}, {pipeline_mode = #tpu.pipeline_mode<synchronous>, transform_indices = @transform_1, window_bounds = array<i64: 4, 9>}, {pipeline_mode = #tpu.pipeline_mode<synchronous>, transform_indices = @transform_2, window_bounds = array<i64: 8, 4>}, {pipeline_mode = #tpu.pipeline_mode<synchronous>, transform_indices = @transform_3, window_bounds = array<i64: 8, 1>}, {pipeline_mode = #tpu.pipeline_mode<synchronous>, transform_indices = @transform_4, window_bounds = array<i64: 1, 324>}, {transform_indices = @transform_5, window_bounds = array<i64: 1, 8, 324>}]} {
    %c0 = arith.constant 0 : index
    %c0_0 = arith.constant 0 : index
    %c0_1 = arith.constant 0 : index
    %0 = vector.load %arg1[%c0, %c0_0, %c0_1] : memref<1x4x362xf32, #tpu.memory_space<vmem>>, vector<1x4x362xf32>
    %1 = vector.shape_cast %0 : vector<1x4x362xf32> to vector<4x362xf32>
    %c0_2 = arith.constant 0 : index
    %c0_3 = arith.constant 0 : index
    %2 = vector.load %arg2[%c0_2, %c0_3] : memref<4x9xf32, #tpu.memory_space<vmem>>, vector<4x9xf32>
    %3 = vector.extract_strided_slice %1 {offsets = [0, 0], sizes = [4, 324], strides = [1, 1]} : vector<4x362xf32> to vector<4x324xf32>
    %4 = vector.extract_strided_slice %2 {offsets = [0, 0], sizes = [4, 1], strides = [1, 1]} : vector<4x9xf32> to vector<4x1xf32>
    %5 = vector.broadcast %4 : vector<4x1xf32> to vector<4x324xf32>
    %6 = arith.mulf %3, %5 : vector<4x324xf32>
    %7 = vector.extract_strided_slice %1 {offsets = [0, 1], sizes = [4, 324], strides = [1, 1]} : vector<4x362xf32> to vector<4x324xf32>
    %8 = vector.extract_strided_slice %2 {offsets = [0, 1], sizes = [4, 1], strides = [1, 1]} : vector<4x9xf32> to vector<4x1xf32>
    %9 = vector.broadcast %8 : vector<4x1xf32> to vector<4x324xf32>
    %10 = arith.mulf %7, %9 : vector<4x324xf32>
    %11 = arith.addf %6, %10 : vector<4x324xf32>
    %12 = vector.extract_strided_slice %1 {offsets = [0, 2], sizes = [4, 324], strides = [1, 1]} : vector<4x362xf32> to vector<4x324xf32>
    %13 = vector.extract_strided_slice %2 {offsets = [0, 2], sizes = [4, 1], strides = [1, 1]} : vector<4x9xf32> to vector<4x1xf32>
    %14 = vector.broadcast %13 : vector<4x1xf32> to vector<4x324xf32>
    %15 = arith.mulf %12, %14 : vector<4x324xf32>
    %16 = arith.addf %11, %15 : vector<4x324xf32>
    %17 = vector.extract_strided_slice %1 {offsets = [0, 18], sizes = [4, 324], strides = [1, 1]} : vector<4x362xf32> to vector<4x324xf32>
    %18 = vector.extract_strided_slice %2 {offsets = [0, 3], sizes = [4, 1], strides = [1, 1]} : vector<4x9xf32> to vector<4x1xf32>
    %19 = vector.broadcast %18 : vector<4x1xf32> to vector<4x324xf32>
    %20 = arith.mulf %17, %19 : vector<4x324xf32>
    %21 = arith.addf %16, %20 : vector<4x324xf32>
    %22 = vector.extract_strided_slice %1 {offsets = [0, 19], sizes = [4, 324], strides = [1, 1]} : vector<4x362xf32> to vector<4x324xf32>
    %23 = vector.extract_strided_slice %2 {offsets = [0, 4], sizes = [4, 1], strides = [1, 1]} : vector<4x9xf32> to vector<4x1xf32>
    %24 = vector.broadcast %23 : vector<4x1xf32> to vector<4x324xf32>
    %25 = arith.mulf %22, %24 : vector<4x324xf32>
    %26 = arith.addf %21, %25 : vector<4x324xf32>
    %27 = vector.extract_strided_slice %1 {offsets = [0, 20], sizes = [4, 324], strides = [1, 1]} : vector<4x362xf32> to vector<4x324xf32>
    %28 = vector.extract_strided_slice %2 {offsets = [0, 5], sizes = [4, 1], strides = [1, 1]} : vector<4x9xf32> to vector<4x1xf32>
    %29 = vector.broadcast %28 : vector<4x1xf32> to vector<4x324xf32>
    %30 = arith.mulf %27, %29 : vector<4x324xf32>
    %31 = arith.addf %26, %30 : vector<4x324xf32>
    %32 = vector.extract_strided_slice %1 {offsets = [0, 36], sizes = [4, 324], strides = [1, 1]} : vector<4x362xf32> to vector<4x324xf32>
    %33 = vector.extract_strided_slice %2 {offsets = [0, 6], sizes = [4, 1], strides = [1, 1]} : vector<4x9xf32> to vector<4x1xf32>
    %34 = vector.broadcast %33 : vector<4x1xf32> to vector<4x324xf32>
    %35 = arith.mulf %32, %34 : vector<4x324xf32>
    %36 = arith.addf %31, %35 : vector<4x324xf32>
    %37 = vector.extract_strided_slice %1 {offsets = [0, 37], sizes = [4, 324], strides = [1, 1]} : vector<4x362xf32> to vector<4x324xf32>
    %38 = vector.extract_strided_slice %2 {offsets = [0, 7], sizes = [4, 1], strides = [1, 1]} : vector<4x9xf32> to vector<4x1xf32>
    %39 = vector.broadcast %38 : vector<4x1xf32> to vector<4x324xf32>
    %40 = arith.mulf %37, %39 : vector<4x324xf32>
    %41 = arith.addf %36, %40 : vector<4x324xf32>
    %42 = vector.extract_strided_slice %1 {offsets = [0, 38], sizes = [4, 324], strides = [1, 1]} : vector<4x362xf32> to vector<4x324xf32>
    %43 = vector.extract_strided_slice %2 {offsets = [0, 8], sizes = [4, 1], strides = [1, 1]} : vector<4x9xf32> to vector<4x1xf32>
    %44 = vector.broadcast %43 : vector<4x1xf32> to vector<4x324xf32>
    %45 = arith.mulf %42, %44 : vector<4x324xf32>
    %46 = arith.addf %41, %45 : vector<4x324xf32>
    %c0_4 = arith.constant 0 : index
    %c0_5 = arith.constant 0 : index
    %47 = vector.load %arg3[%c0_4, %c0_5] : memref<8x4xf32, #tpu.memory_space<vmem>>, vector<8x4xf32>
    %c0_6 = arith.constant 0 : index
    %c0_7 = arith.constant 0 : index
    %48 = vector.load %arg4[%c0_6, %c0_7] : memref<8x1xf32, #tpu.memory_space<vmem>>, vector<8x1xf32>
    %49 = vector.extract_strided_slice %47 {offsets = [0, 0], sizes = [8, 1], strides = [1, 1]} : vector<8x4xf32> to vector<8x1xf32>
    %50 = vector.extract_strided_slice %46 {offsets = [0, 0], sizes = [1, 324], strides = [1, 1]} : vector<4x324xf32> to vector<1x324xf32>
    %51 = vector.broadcast %49 : vector<8x1xf32> to vector<8x324xf32>
    %52 = vector.broadcast %50 : vector<1x324xf32> to vector<8x324xf32>
    %53 = arith.mulf %51, %52 : vector<8x324xf32>
    %54 = vector.broadcast %48 : vector<8x1xf32> to vector<8x324xf32>
    %55 = arith.addf %54, %53 : vector<8x324xf32>
    %56 = vector.extract_strided_slice %47 {offsets = [0, 1], sizes = [8, 1], strides = [1, 1]} : vector<8x4xf32> to vector<8x1xf32>
    %57 = vector.extract_strided_slice %46 {offsets = [1, 0], sizes = [1, 324], strides = [1, 1]} : vector<4x324xf32> to vector<1x324xf32>
    %58 = vector.broadcast %56 : vector<8x1xf32> to vector<8x324xf32>
    %59 = vector.broadcast %57 : vector<1x324xf32> to vector<8x324xf32>
    %60 = arith.mulf %58, %59 : vector<8x324xf32>
    %61 = arith.addf %55, %60 : vector<8x324xf32>
    %62 = vector.extract_strided_slice %47 {offsets = [0, 2], sizes = [8, 1], strides = [1, 1]} : vector<8x4xf32> to vector<8x1xf32>
    %63 = vector.extract_strided_slice %46 {offsets = [2, 0], sizes = [1, 324], strides = [1, 1]} : vector<4x324xf32> to vector<1x324xf32>
    %64 = vector.broadcast %62 : vector<8x1xf32> to vector<8x324xf32>
    %65 = vector.broadcast %63 : vector<1x324xf32> to vector<8x324xf32>
    %66 = arith.mulf %64, %65 : vector<8x324xf32>
    %67 = arith.addf %61, %66 : vector<8x324xf32>
    %68 = vector.extract_strided_slice %47 {offsets = [0, 3], sizes = [8, 1], strides = [1, 1]} : vector<8x4xf32> to vector<8x1xf32>
    %69 = vector.extract_strided_slice %46 {offsets = [3, 0], sizes = [1, 324], strides = [1, 1]} : vector<4x324xf32> to vector<1x324xf32>
    %70 = vector.broadcast %68 : vector<8x1xf32> to vector<8x324xf32>
    %71 = vector.broadcast %69 : vector<1x324xf32> to vector<8x324xf32>
    %72 = arith.mulf %70, %71 : vector<8x324xf32>
    %73 = arith.addf %67, %72 : vector<8x324xf32>
    %cst = arith.constant 0.000000e+00 : f32
    %74 = vector.broadcast %cst : f32 to vector<8x324xf32>
    %75 = arith.maximumf %73, %74 : vector<8x324xf32>
    %c0_8 = arith.constant 0 : index
    %c0_9 = arith.constant 0 : index
    %76 = vector.load %arg5[%c0_8, %c0_9] : memref<1x324xf32, #tpu.memory_space<vmem>>, vector<1x324xf32>
    %77 = vector.broadcast %76 : vector<1x324xf32> to vector<8x324xf32>
    %78 = arith.mulf %75, %77 : vector<8x324xf32>
    %c0_10 = arith.constant 0 : index
    %c0_11 = arith.constant 0 : index
    %c0_12 = arith.constant 0 : index
    %79 = vector.load %arg6[%c0_10, %c0_11, %c0_12] : memref<1x8x324xf32, #tpu.memory_space<vmem>>, vector<1x8x324xf32>
    %80 = vector.shape_cast %79 : vector<1x8x324xf32> to vector<8x324xf32>
    %81 = vector.shape_cast %78 : vector<8x324xf32> to vector<1x8x324xf32>
    tpu.vector_store %arg6[%c0_10, %c0_11, %c0_12], %81 {strides = array<i32>} : memref<1x8x324xf32, #tpu.memory_space<vmem>>, vector<1x8x324xf32>,
    return
  }
  func.func @transform_0(%arg0: i32) -> (i32, i32, i32) {
    %c0_i32 = arith.constant 0 : i32
    %c0_i32_0 = arith.constant 0 : i32
    %c0_i32_1 = arith.constant 0 : i32
    return %arg0, %c0_i32, %c0_i32_0 : i32, i32, i32
  }
  func.func @transform_1(%arg0: i32) -> (i32, i32) {
    %c0_i32 = arith.constant 0 : i32
    %c0_i32_0 = arith.constant 0 : i32
    %c0_i32_1 = arith.constant 0 : i32
    return %c0_i32, %c0_i32_0 : i32, i32
  }
  func.func @transform_2(%arg0: i32) -> (i32, i32) {
    %c0_i32 = arith.constant 0 : i32
    %c0_i32_0 = arith.constant 0 : i32
    %c0_i32_1 = arith.constant 0 : i32
    return %c0_i32, %c0_i32_0 : i32, i32
  }
  func.func @transform_3(%arg0: i32) -> (i32, i32) {
    %c0_i32 = arith.constant 0 : i32
    %c0_i32_0 = arith.constant 0 : i32
    %c0_i32_1 = arith.constant 0 : i32
    return %c0_i32, %c0_i32_0 : i32, i32
  }
  func.func @transform_4(%arg0: i32) -> (i32, i32) {
    %c0_i32 = arith.constant 0 : i32
    %c0_i32_0 = arith.constant 0 : i32
    %c0_i32_1 = arith.constant 0 : i32
    return %c0_i32, %c0_i32_0 : i32, i32
  }
  func.func @transform_5(%arg0: i32) -> (i32, i32, i32) {
    %c0_i32 = arith.constant 0 : i32
    %c0_i32_0 = arith.constant 0 : i32
    %c0_i32_1 = arith.constant 0 : i32
    return %arg0, %c0_i32, %c0_i32_0 : i32, i32, i32
  }
}

</mosaic_0001>

<bundles_post_ra>
// kernel: depth_sep_conv.1
= control target key start
LH: loop header
LB: loop body
LE: loop exit
PB: predicated region body
PF: predicated region fallthrough
CT: control target
= control target key end

     0   :  { %s814_s18 = smov 0   ;;  %s907_s0 = inlined_call_operand.vmem [shape: f32[2,4,362], index: 0, kind: input, shape index: {}]   ;;  %s908_s1 = inlined_call_operand.vmem [shape: f32[4,9], index: 1, kind: input, shape index: {}]   ;;  %s909_s2 = inlined_call_operand.vmem [shape: f32[8,4], index: 2, kind: input, shape index: {}]   ;;  %s910_s3 = inlined_call_operand.vmem [shape: f32[8,1], index: 3, kind: input, shape index: {}]   ;;  %s911_s4 = inlined_call_operand.vmem [shape: f32[1,324], index: 4, kind: input, shape index: {}]   ;;  %s912_s5 = inlined_call_operand.vmem [shape: f32[2,8,324], index: 5, kind: output, shape index: {}]  }
   0x1 LB: > { %s707_s19 = sadd.s32 4294967295, %s764_s18   ;;  %p711_p0 = scmp.ge.s32.totalorder %s764_s18, 1  ;;  %s764_s18 = sphi %s814_s18, %s15_s18  }
   0x2   : > { %p187_p1 = scmp.lt.s32.totalorder %s764_s18, 3 }
   0x4   : > { %p188_p2 = pnand %p711_p0, %p187_p1 }
   0x5   : > { %v227_v0 = vld [vmem:[%s908_s1] sm:$0xf] (!%p188_p2)  ;;  %v766_v1 = vmov (!%p188_p2), 1   ;;  %v767_v2 = vmov (!%p188_p2), 3   ;;  %v768_v3 = vmov (!%p188_p2), 2   ;;  %v769_v4 = vmov (!%p188_p2), 4  }
   0x6   : > { %191 = sbr.rel (%p188_p2) target bundleno = 323 (0x143), region = 40  ;;  %744 = vset.pattern.permute.xlu0 (!%p188_p2), %v766_v1  ;;  %746 = vset.pattern.permute.xlu1 (!%p188_p2), %v767_v2  ;;  %v770_v5 = vmov (!%p188_p2), 5   ;;  %v771_v6 = vmov (!%p188_p2), 6   ;;  %v772_v7 = vmov (!%p188_p2), 7   ;;  %v773_v8 = vmov (!%p188_p2), 0   ;;  %p215_p3 = scmp.lt.s32.totalorder (!%p188_p2), %s707_s19, 1 }
   0x7   : > { %243 = vperm.xlu0 (!%p188_p2), %744, %v227_v0   ;;  %300 = vperm.xlu1 (!%p188_p2), %746, %v227_v0   ;;  %v774_v9 = vmov (!%p188_p2), 8   ;;  %v775_v10 = vmov (!%p188_p2), 839922192   ;;  %v235_v12 = vlaneseq (!%p188_p2)  ;;  %s776_s26 = smov (!%p188_p2), 127   ;;  %s777_s27 = smov (!%p188_p2), 126   ;;  %v467_v54 = vld [vmem:[%s909_s2] sm:$0xff] (!%p188_p2) }
   0x8   : > { %v233_v11 = vunpack.c.l.s4 (!%p188_p2), %v775_v10  ;;  %s778_s28 = smov (!%p188_p2), 110   ;;  %s779_s29 = smov (!%p188_p2), 109   ;;  %v468_v55 = vld [vmem:[%s910_s3] sm:$0xff] (!%p188_p2)  ;;  %vm263_vm0 = vcmask (!%p188_p2), 1043456   ;;  %vm265_vm1 = vcmask (!%p188_p2), 1039360   ;;  %vm293_vm2 = vcmask (!%p188_p2), 1031168  }
   0x9   : > { %v834_v14 = vshrl.u32 (!%p188_p2), %v235_v12, 7  ;;  %s780_s30 = smov (!%p188_p2), 108   ;;  %s781_s6 = smov (!%p188_p2), 92   ;;  %vm321_vm3 = vcmask (!%p188_p2), 900096   ;;  %vm349_vm4 = vcmask (!%p188_p2), 891904   ;;  %vm377_vm5 = vcmask (!%p188_p2), 883712  }
   0xa   : > { %v234_v13 = vunpack.c.0.s8 (!%p188_p2), %v233_v11  ;;  %s782_s7 = smov (!%p188_p2), 91   ;;  %s783_s8 = smov (!%p188_p2), 90   ;;  %vm405_vm6 = vcmask (!%p188_p2), 752640   ;;  %vm433_vm7 = vcmask (!%p188_p2), 744448   ;;  %vm461_vm8 = vcmask (!%p188_p2), 736256  }
   0xb   : > { %745 = vset.pattern.permute.xlu0 (!%p188_p2), %v768_v3  ;;  %747 = vset.pattern.permute.xlu1 (!%p188_p2), %v769_v4  ;;  %vm650_vm9 = vcmask (!%p188_p2), 556032  }
   0xc   : > { %272 = vperm.xlu0 (!%p188_p2), %745, %v227_v0   ;;  %328 = vperm.xlu1 (!%p188_p2), %747, %v227_v0   ;;  %v237_v15 = vsub.s32 (!%p188_p2), %v234_v13, %v834_v14 }
   0xd   : > { %s914_s19 = smov (!%p215_p3, %s707_s19), 1 }
   0xe   : > { %s716_s22 = smul.u32 12, %s914_s19 }
   0xf   : > { %s717_s15 = smul.u32 24, %s914_s19 }
  0x10   : > { %748 = vset.pattern.permute.xlu1 %v770_v5  ;;  %749 = vset.pattern.permute.xlu0 %v771_v6  ;;  %s219_s25 = scalar_lea.vmem %s907_s0, %s716_s22 }
  0x11   : > { %356 = vperm.xlu1 %748, %v227_v0   ;;  %384 = vperm.xlu0 %749, %v227_v0   ;;  %v225_v17 = vld [vmem:[%s219_s25] sm:$0xff]  ;;  %v226_v21 = vld [vmem:[%s219_s25 + $0x8] sm:$0xf]  ;;  %s224_s20 = scalar_lea.vmem %s912_s5, %s717_s15 }
  0x15   : > { %750 = vset.pattern.permute.xlu1 %v772_v7  ;;  %752 = vset.pattern.permute.xlu0 %v773_v8 }
  0x16   : > { %412 = vperm.xlu1 %750, %v227_v0   ;;  %230 = vperm.xlu0 %752, %v227_v0  }
  0x1a   : > { %751 = vset.pattern.permute.xlu1 %v774_v9 }
  0x1b   : > { %440 = vperm.xlu1 %751, %v227_v0  }
  0x1f   : > { %753 = vset.pattern.permute.xlu1 %v773_v8 }
  0x86   : > { %v244_v16 = vpop.permute.xlu0 %243  ;;  %v301_v18 = vpop.permute.xlu1 %300 }
  0x87   : > { %v251_v19 = vrot.slane %v244_v16, %v237_v15  ;;  %v308_v25 = vrot.slane %v301_v18, %v237_v15 }
  0x89   : > { %v253_v20 = vmul.f32 %v251_v19, %v225_v17  ;;  %v254_v26 = vmul.f32 %v251_v19, %v226_v21  ;;  %v310_v29 = vmul.f32 %v308_v25, %v225_v17  ;;  %v311_v35 = vmul.f32 %v308_v25, %v226_v21 }
  0x8b   : > { %v273_v22 = vpop.permute.xlu0 %272  ;;  %257 = vrot.lane.b32.xlu1 %v253_v20, %s776_s26  ;;  %v329_v23 = vpop.permute.xlu1 %328 }
  0x8c   : > { %v280_v24 = vrot.slane %v273_v22, %v237_v15  ;;  %v336_v30 = vrot.slane %v329_v23, %v237_v15 }
  0x8e   : > { %v282_v27 = vmul.f32 %v280_v24, %v225_v17  ;;  %v283_v28 = vmul.f32 %v280_v24, %v226_v21  ;;  %v338_v33 = vmul.f32 %v336_v30, %v225_v17  ;;  %v339_v38 = vmul.f32 %v336_v30, %v226_v21 }
  0x8f   : > { %259 = vrot.lane.b32.xlu1 %v254_v26, %s776_s26 }
  0x90   : > { %286 = vrot.lane.b32.xlu0 %v282_v27, %s777_s27  ;;  %v357_v31 = vpop.permute.xlu1 %356  ;;  %v385_v32 = vpop.permute.xlu0 %384 }
  0x91   : > { %v364_v34 = vrot.slane %v357_v31, %v237_v15  ;;  %v392_v41 = vrot.slane %v385_v32, %v237_v15 }
  0x93   : > { %288 = vrot.lane.b32.xlu1 %v283_v28, %s777_s27  ;;  %v366_v40 = vmul.f32 %v364_v34, %v225_v17  ;;  %v367_v44 = vmul.f32 %v364_v34, %v226_v21  ;;  %v394_v45 = vmul.f32 %v392_v41, %v225_v17  ;;  %v395_v48 = vmul.f32 %v392_v41, %v226_v21 }
  0x94   : > { %314 = vrot.lane.b32.xlu0 %v310_v29, %s778_s28 }
  0x95   : > { %v231_v36 = vpop.permute.xlu0 %230  ;;  %v413_v39 = vpop.permute.xlu1 %412 }
  0x96   : > { %v238_v37 = vrot.slane %v231_v36, %v237_v15  ;;  %v420_v46 = vrot.slane %v413_v39, %v237_v15 }
  0x97   : > { %316 = vrot.lane.b32.xlu1 %v311_v35, %s778_s28 }
  0x98   : > { %342 = vrot.lane.b32.xlu0 %v338_v33, %s779_s29  ;;  %v841_v42 = vmul.f32 %v238_v37, %v225_v17  ;;  %v843_v43 = vmul.f32 %v238_v37, %v226_v21  ;;  %v422_v49 = vmul.f32 %v420_v46, %v225_v17  ;;  %v423_v51 = vmul.f32 %v420_v46, %v226_v21 }
  0x9a   : > { %v441_v47 = vpop.permute.xlu1 %440 }
  0x9b   : > { %344 = vrot.lane.b32.xlu1 %v339_v38, %s779_s29  ;;  %v448_v50 = vrot.slane %v441_v47, %v237_v15 }
  0x9c   : > { %370 = vrot.lane.b32.xlu0 %v366_v40, %s780_s30 }
  0x9d   : > { %v450_v52 = vmul.f32 %v448_v50, %v225_v17  ;;  %v451_v53 = vmul.f32 %v448_v50, %v226_v21 }
  0x9f   : > { %372 = vrot.lane.b32.xlu1 %v367_v44, %s780_s30 }
  0xa0   : > { %398 = vrot.lane.b32.xlu0 %v394_v45, %s781_s6 }
  0xa3   : > { %400 = vrot.lane.b32.xlu1 %v395_v48, %s781_s6 }
  0xa4   : > { %426 = vrot.lane.b32.xlu0 %v422_v49, %s782_s7 }
  0xa7   : > { %428 = vrot.lane.b32.xlu1 %v423_v51, %s782_s7 }
  0xa8   : > { %454 = vrot.lane.b32.xlu0 %v450_v52, %s783_s8 }
  0xab   : > { %456 = vrot.lane.b32.xlu1 %v451_v53, %s783_s8 }
  0xac   : > { %471 = vperm.xlu0 %752, %v467_v54  }
  0xaf   : > { %508 = vperm.xlu1 %753, %v468_v55  }
  0xb0   : > { %754 = vset.pattern.permute.xlu0 %v766_v1 }
  0xb1   : > { %515 = vperm.xlu0 %754, %v467_v54  }
  0xb3   : > { %755 = vset.pattern.permute.xlu1 %v768_v3 }
  0xb4   : > { %552 = vperm.xlu1 %755, %v467_v54  }
  0xb5   : > { %757 = vset.pattern.permute.xlu0 %v767_v2 }
  0xb8   : > { %756 = vset.pattern.permute.xlu1 %v767_v2 }
  0xb9   : > { %589 = vperm.xlu1 %756, %v467_v54  }
  0xfd   : > { %v258_v56 = vpop.permute.xlu1 %257 }
  0xfe   : > { %v261_v1 = vrot.slane %v258_v56, 4 }
 0x101   : > { %v260_v57 = vpop.permute.xlu1 %259 }
 0x102   : > { %v287_v58 = vpop.permute.xlu0 %286  ;;  %v262_v63 = vrot.slane %v260_v57, 4  ;;  %v270_v25 = vadd.f32 %v260_v57, %v843_v43 }
 0x103   : > { %v290_v4 = vrot.slane %v287_v58, 4 }
 0x104   : > { %v264_v6 = vsel %vm263_vm0, %v261_v1, %v262_v63  ;;  %v561_v1 = vsub.s32 6, %v834_v14 }
 0x105   : > { %v289_v59 = vpop.permute.xlu1 %288  ;;  %v266_v13 = vsel %vm265_vm1, %v258_v56, %v264_v6  ;;  %v482_v56 = vsub.s32 4, %v834_v14 }
 0x106   : > { %v315_v60 = vpop.permute.xlu0 %314  ;;  %v291_v5 = vrot.slane %v289_v59, 4  ;;  %v269_v20 = vadd.f32 %v266_v13, %v841_v42  ;;  %v298_v30 = vadd.f32 %v289_v59, %v270_v25  ;;  %v870_v59 = vsub.s32 1, %v834_v14 }
 0x107   : > { %v318_v9 = vrot.slane %v315_v60, 4 }
 0x108   : > { %v292_v8 = vsel %vm263_vm0, %v290_v4, %v291_v5 }
 0x109   : > { %v317_v61 = vpop.permute.xlu1 %316  ;;  %v294_v18 = vsel %vm293_vm2, %v287_v58, %v292_v8  ;;  %v867_v58 = vsub.s32 0, %v834_v14 }
 0x10a   : > { %v343_v62 = vpop.permute.xlu0 %342  ;;  %v319_v7 = vrot.slane %v317_v61, 4  ;;  %v297_v27 = vadd.f32 %v294_v18, %v269_v20  ;;  %v326_v37 = vadd.f32 %v317_v61, %v298_v30 }
 0x10b   : > { %v346_v10 = vrot.slane %v343_v62, 4 }
 0x10c   : > { %v320_v15 = vsel %vm263_vm0, %v318_v9, %v319_v7 }
 0x10d   : > { %v345_v0 = vpop.permute.xlu1 %344  ;;  %v322_v26 = vsel %vm321_vm3, %v315_v60, %v320_v15  ;;  %v524_v60 = vsub.s32 5, %v834_v14 }
 0x10e   : > { %v371_v3 = vpop.permute.xlu0 %370  ;;  %v347_v11 = vrot.slane %v345_v0, 4  ;;  %v325_v33 = vadd.f32 %v322_v26, %v297_v27  ;;  %v354_v42 = vadd.f32 %v345_v0, %v326_v37  ;;  %v876_v0 = vsub.s32 2, %v834_v14 }
 0x10f   : > { %v374_v16 = vrot.slane %v371_v3, 4 }
 0x110   : > { %v348_v21 = vsel %vm263_vm0, %v346_v10, %v347_v11  ;;  %v594_v10 = vsub.s32 3, %v834_v14  ;;  %v598_v11 = vsub.s32 7, %v834_v14 }
 0x111   : > { %v373_v2 = vpop.permute.xlu1 %372  ;;  %v350_v31 = vsel %vm349_vm4, %v343_v62, %v348_v21 }
 0x112   : > { %v399_v12 = vpop.permute.xlu0 %398  ;;  %v375_v17 = vrot.slane %v373_v2, 4  ;;  %v353_v39 = vadd.f32 %v350_v31, %v325_v33  ;;  %v382_v47 = vadd.f32 %v373_v2, %v354_v42  ;;  %v628_v42 = vld [vmem:[%s911_s4] sm:$0x7] }
 0x113   : > { %v402_v22 = vrot.slane %v399_v12, 4 }
 0x114   : > { %v376_v28 = vsel %vm263_vm0, %v374_v16, %v375_v17 }
 0x115   : > { %v401_v19 = vpop.permute.xlu1 %400  ;;  %v378_v38 = vsel %vm377_vm5, %v371_v3, %v376_v28 }
 0x116   : > { %v403_v23 = vrot.slane %v401_v19, 4  ;;  %v427_v24 = vpop.permute.xlu0 %426  ;;  %v381_v45 = vadd.f32 %v378_v38, %v353_v39  ;;  %v410_v51 = vadd.f32 %v401_v19, %v382_v47 }
 0x117   : > { %v430_v29 = vrot.slane %v427_v24, 4 }
 0x118   : > { %v404_v34 = vsel %vm263_vm0, %v402_v22, %v403_v23 }
 0x119   : > { %v429_v32 = vpop.permute.xlu1 %428  ;;  %v406_v43 = vsel %vm405_vm6, %v399_v12, %v404_v34 }
 0x11a   : > { %v431_v35 = vrot.slane %v429_v32, 4  ;;  %v455_v36 = vpop.permute.xlu0 %454  ;;  %v409_v49 = vadd.f32 %v406_v43, %v381_v45  ;;  %v438_v54 = vadd.f32 %v429_v32, %v410_v51 }
 0x11b   : > { %v458_v41 = vrot.slane %v455_v36, 4 }
 0x11c   : > { %v432_v40 = vsel %vm263_vm0, %v430_v29, %v431_v35 }
 0x11d   : > { %v457_v44 = vpop.permute.xlu1 %456  ;;  %v434_v48 = vsel %vm433_vm7, %v427_v24, %v432_v40 }
 0x11e   : > { %v459_v46 = vrot.slane %v457_v44, 4  ;;  %v437_v53 = vadd.f32 %v434_v48, %v409_v49  ;;  %v466_v57 = vadd.f32 %v457_v44, %v438_v54  ;;  %v641_v54 = vrot.slane %v628_v42, %v876_v0 }
 0x120   : > { %v460_v50 = vsel %vm263_vm0, %v458_v41, %v459_v46  ;;  %v487_v63 = vrot.slane %v466_v57, %v867_v58  ;;  %v529_v6 = vrot.slane %v466_v57, %v870_v59  ;;  %v566_v9 = vrot.slane %v466_v57, %v876_v0 }
 0x121   : > { %v462_v52 = vsel %vm461_vm8, %v455_v36, %v460_v50  ;;  %v603_v26 = vrot.slane %v466_v57, %v594_v10 }
 0x122   : > { %v465_v55 = vadd.f32 %v462_v52, %v437_v53  ;;  %v502_v8 = vrot.slane %v487_v63, %v867_v58  ;;  %v544_v21 = vrot.slane %v529_v6, %v870_v59  ;;  %v581_v31 = vrot.slane %v566_v9, %v876_v0 }
 0x123   : > { %v618_v41 = vrot.slane %v603_v26, %v594_v10  ;;  %v633_v52 = vrot.slane %v628_v42, %v867_v58  ;;  %v637_v53 = vrot.slane %v628_v42, %v870_v59 }
 0x124   : > { %v479_v61 = vrot.slane %v465_v55, %v867_v58  ;;  %v483_v62 = vrot.slane %v465_v55, %v482_v56  ;;  %v521_v5 = vrot.slane %v465_v55, %v870_v59  ;;  %v525_v3 = vrot.slane %v465_v55, %v524_v60 }
 0x125   : > { %v558_v16 = vrot.slane %v465_v55, %v876_v0  ;;  %v562_v17 = vrot.slane %v465_v55, %v561_v1  ;;  %v595_v33 = vrot.slane %v465_v55, %v594_v10  ;;  %v599_v34 = vrot.slane %v465_v55, %v598_v11 }
 0x126   : > { %v494_v7 = vrot.slane %v479_v61, %v867_v58  ;;  %v498_v2 = vrot.slane %v483_v62, %v867_v58  ;;  %v536_v19 = vrot.slane %v521_v5, %v870_v59  ;;  %v540_v20 = vrot.slane %v525_v3, %v870_v59 }
 0x127   : > { %v573_v28 = vrot.slane %v558_v16, %v876_v0  ;;  %v577_v29 = vrot.slane %v562_v17, %v876_v0  ;;  %v610_v43 = vrot.slane %v595_v33, %v594_v10  ;;  %v614_v44 = vrot.slane %v599_v34, %v594_v10 }
 0x12b   : > { %v472_v4 = vpop.permute.xlu0 %471 }
 0x12c   : > { %v503_v12 = vmul.f32 %v494_v7, %v472_v4  ;;  %v504_v13 = vmul.f32 %v498_v2, %v472_v4  ;;  %v505_v18 = vmul.f32 %v502_v8, %v472_v4 }
 0x12e   : > { %v509_v15 = vpop.permute.xlu1 %508 }
 0x12f   : > { %v511_v27 = vadd.f32 %v509_v15, %v503_v12  ;;  %v512_v14 = vadd.f32 %v509_v15, %v504_v13  ;;  %v513_v30 = vadd.f32 %v509_v15, %v505_v18 }
 0x130   : > { %v516_v22 = vpop.permute.xlu0 %515 }
 0x131   : > { %v545_v23 = vmul.f32 %v536_v19, %v516_v22  ;;  %v546_v24 = vmul.f32 %v540_v20, %v516_v22  ;;  %v547_v25 = vmul.f32 %v544_v21, %v516_v22 }
 0x133   : > { %v553_v32 = vpop.permute.xlu1 %552  ;;  %v548_v35 = vadd.f32 %v545_v23, %v511_v27  ;;  %v549_v36 = vadd.f32 %v546_v24, %v512_v14  ;;  %v550_v39 = vadd.f32 %v547_v25, %v513_v30 }
 0x134   : > { %v582_v37 = vmul.f32 %v573_v28, %v553_v32  ;;  %v583_v38 = vmul.f32 %v577_v29, %v553_v32  ;;  %v584_v40 = vmul.f32 %v581_v31, %v553_v32 }
 0x136   : > { %v585_v45 = vadd.f32 %v582_v37, %v548_v35  ;;  %v586_v46 = vadd.f32 %v583_v38, %v549_v36  ;;  %v587_v48 = vadd.f32 %v584_v40, %v550_v39 }
 0x138   : > { %v590_v47 = vpop.permute.xlu1 %589 }
 0x139   : > { %v619_v49 = vmul.f32 %v610_v43, %v590_v47  ;;  %v620_v50 = vmul.f32 %v614_v44, %v590_v47  ;;  %v621_v51 = vmul.f32 %v618_v41, %v590_v47 }
 0x13b   : > { %v622_v55 = vadd.f32 %v619_v49, %v585_v45  ;;  %v623_v56 = vadd.f32 %v620_v50, %v586_v46  ;;  %v624_v57 = vadd.f32 %v621_v51, %v587_v48 }
 0x13d   : > { %v625_v60 = vmax.f32 %v622_v55, 0.0  ;;  %v626_v61 = vmax.f32 %v623_v56, 0.0  ;;  %v627_v62 = vmax.f32 %v624_v57, 0.0 }
 0x13f   : > { %v645_v63 = vmul.f32 %v633_v52, %v625_v60  ;;  %v646_v1 = vmul.f32 %v637_v53, %v626_v61  ;;  %v647_v4 = vmul.f32 %v641_v54, %v627_v62 }
 0x141   : > { %648 = vst [vmem:[%s224_s20] sm:$0xff] %v645_v63  ;;  %649 = vst [vmem:[%s224_s20 + $0x8] sm:$0xff] %v646_v1 }
 0x142   : > { %651 = vst.msk [vmem:[%s224_s20 + $0x10] sm:$0xff] %vm650_vm9, %v647_v4 }
 0x143 PF: > { %s15_s18 = sadd.s32 1, %s764_s18  }
 0x144   : > { %p12_p4 = scmp.ge.s32.totalorder %s15_s18, 4  }
 0x146   :  { %14 = sbr.rel (!%p12_p4) target bundleno = 1 (0x1), region = 70 }

</bundles_post_ra>
